<compile_context>
chip_gen: v7x
topology: tpu7x:2x2x1
jax: 0.10.0
libtpu: 0.0.40
codegen_flags: <defaults>
</compile_context>

<pallas_src>
import functools

import jax
import jax.numpy as jnp
from jax.experimental import pallas as pl
from jax.experimental.pallas import tpu as pltpu

_LANES = 512        # lane-dense last dim (multiple of 128)
_TILE_ROWS = 512    # 512 x 512 x 4 B = 1 MiB per f32 block


def _round_up(a, b):
    return (a + b - 1) // b * b


def _dropout_kernel(x_ref, o_ref, *, threshold, scale, seed):
    tile_rows, lanes = x_ref.shape
    i = pl.program_id(0)

    # Global element index of every lane in this tile (uint32 counter) ->
    # each grid step automatically draws a distinct random stream.
    row = jax.lax.broadcasted_iota(jnp.uint32, (tile_rows, lanes), 0)
    col = jax.lax.broadcasted_iota(jnp.uint32, (tile_rows, lanes), 1)
    row_off = (i * tile_rows).astype(jnp.uint32)
    idx = (row + row_off) * jnp.uint32(lanes) + col

    # Stateless 32-bit mixing hash (lowbias32 finalizer) of (index ^ seed).
    h = idx ^ jnp.uint32(seed)
    h = (h ^ (h >> jnp.uint32(16))) * jnp.uint32(0x7FEB352D)
    h = (h ^ (h >> jnp.uint32(15))) * jnp.uint32(0x846CA68B)
    h = h ^ (h >> jnp.uint32(16))

    # keep iff uniform > p  <=>  bits >= p * 2^32   (exact integer threshold)
    keep = h >= jnp.uint32(threshold)

    x = x_ref[...].astype(jnp.float32)
    out = jnp.where(keep, x * jnp.float32(scale), jnp.float32(0.0))
    o_ref[...] = out.astype(o_ref.dtype)


def dropout_pallas(x, *, p=0.5, seed=0, training=True):
    """Pallas implementation of the framework Dropout.forward (out-of-place)."""
    if p < 0.0 or p > 1.0:
        raise ValueError(
            "Dropout probability has to be between 0 and 1, but got {}".format(p)
        )
    if not training or p == 0.0:
        # eval mode / p=0: identity
        return x
    if p == 1.0:
        # Reference module would compute x * 0 / 0 (NaN); return the
        # well-defined "drop everything" result instead.
        return jnp.zeros_like(x)

    # NOTE: for tensors this small, plain XLA / fusion would beat a dedicated
    # kernel launch; we always dispatch to Pallas here to exercise the kernel.
    orig_shape = x.shape
    orig_dtype = x.dtype
    n = x.size
    flat = x.reshape(-1)

    rows = pl.cdiv(n, _LANES)
    tile_r = _TILE_ROWS if rows >= _TILE_ROWS else _round_up(rows, 16)
    rows_p = _round_up(rows, tile_r)
    pad = rows_p * _LANES - n
    if pad:
        flat = jnp.pad(flat, (0, pad))
    x2 = flat.reshape(rows_p, _LANES)

    threshold = min(int(round(p * 2.0 ** 32)), 2 ** 32 - 1)
    scale = 1.0 / (1.0 - p)

    out2 = pl.pallas_call(
        functools.partial(
            _dropout_kernel,
            threshold=threshold,
            scale=scale,
            seed=int(seed) & 0xFFFFFFFF,
        ),
        out_shape=jax.ShapeDtypeStruct((rows_p, _LANES), orig_dtype),
        grid=(rows_p // tile_r,),
        in_specs=[pl.BlockSpec((tile_r, _LANES), lambda i: (i, 0))],
        out_specs=pl.BlockSpec((tile_r, _LANES), lambda i: (i, 0)),
        compiler_params=pltpu.CompilerParams(
            dimension_semantics=("parallel",),
            vmem_limit_bytes=32 * 1024 * 1024,
        ),
    )(x2)

    return out2.reshape(-1)[:n].reshape(orig_shape)


if __name__ == "__main__":
    key = jax.random.PRNGKey(0)
    # NCHW, matching typical usage of the framework (small shapes)
    x = jax.random.normal(key, (2, 4, 16, 16), dtype=jnp.float32)

    p = 0.5
    out = dropout_pallas(x, p=p, seed=1234, training=True)
    out = jax.block_until_ready(out)

    assert out.shape == x.shape and out.dtype == x.dtype
    # kept entries equal x / (1 - p); dropped entries are exactly 0.
    kept = out != 0.0  # exact-zero inputs are measure-zero for normal samples
    assert jnp.allclose(out[kept], (x / (1.0 - p))[kept], rtol=1e-6, atol=1e-6)
    keep_frac = float(jnp.mean(kept.astype(jnp.float32)))
    assert 0.35 < keep_frac < 0.65, keep_frac  # loose sanity for p = 0.5

    # eval mode is identity
    out_eval = jax.block_until_ready(dropout_pallas(x, p=p, training=False))
    assert jnp.array_equal(out_eval, x)

    # p = 0 identity; p = 1 drops everything
    assert jnp.array_equal(jax.block_until_ready(dropout_pallas(x, p=0.0)), x)
    assert bool(jnp.all(jax.block_until_ready(dropout_pallas(x, p=1.0)) == 0.0))

    print("KERNEL_OK")
</pallas_src>

<mosaic_0001>
module attributes {stable_mosaic.version = 11 : i64} {
  func.func @_dropout_kernel(%arg0: i32, %arg1: memref<16x512xf32, #tpu.memory_space<vmem>>, %arg2: memref<16x512xf32, #tpu.memory_space<vmem>>) attributes {dimension_semantics = [#tpu.dimension_semantics<parallel>], iteration_bounds = array<i64: 1>, scalar_prefetch = 0 : i64, scratch_operands = 0 : i64, tpu.core_type = #tpu.core_type<tc>, window_params = [{transform_indices = @transform_0, window_bounds = array<i64: 16, 512>}, {transform_indices = @transform_1, window_bounds = array<i64: 16, 512>}]} {
    %0 = tpu.iota {dimensions = array<i32: 0>} : vector<16x512xi32>
    %1 = tpu.iota {dimensions = array<i32: 1>} : vector<16x512xi32>
    %c16_i32 = arith.constant 16 : i32
    %2 = arith.muli %arg0, %c16_i32 : i32
    %3 = vector.broadcast %2 : i32 to vector<16x512xi32>
    %4 = arith.addi %0, %3 : vector<16x512xi32>
    %c512_i32 = arith.constant 512 : i32
    %5 = vector.broadcast %c512_i32 : i32 to vector<16x512xi32>
    %6 = arith.muli %4, %5 : vector<16x512xi32>
    %7 = arith.addi %6, %1 : vector<16x512xi32>
    %c1234_i32 = arith.constant 1234 : i32
    %8 = vector.broadcast %c1234_i32 : i32 to vector<16x512xi32>
    %9 = arith.xori %7, %8 : vector<16x512xi32>
    %c16_i32_0 = arith.constant 16 : i32
    %10 = vector.broadcast %c16_i32_0 : i32 to vector<16x512xi32>
    %11 = arith.shrui %9, %10 : vector<16x512xi32>
    %12 = arith.xori %9, %11 : vector<16x512xi32>
    %c2146121005_i32 = arith.constant 2146121005 : i32
    %13 = vector.broadcast %c2146121005_i32 : i32 to vector<16x512xi32>
    %14 = arith.muli %12, %13 : vector<16x512xi32>
    %c15_i32 = arith.constant 15 : i32
    %15 = vector.broadcast %c15_i32 : i32 to vector<16x512xi32>
    %16 = arith.shrui %14, %15 : vector<16x512xi32>
    %17 = arith.xori %14, %16 : vector<16x512xi32>
    %c-2073254261_i32 = arith.constant -2073254261 : i32
    %18 = vector.broadcast %c-2073254261_i32 : i32 to vector<16x512xi32>
    %19 = arith.muli %17, %18 : vector<16x512xi32>
    %c16_i32_1 = arith.constant 16 : i32
    %20 = vector.broadcast %c16_i32_1 : i32 to vector<16x512xi32>
    %21 = arith.shrui %19, %20 : vector<16x512xi32>
    %22 = arith.xori %19, %21 : vector<16x512xi32>
    %c-2147483648_i32 = arith.constant -2147483648 : i32
    %23 = vector.broadcast %c-2147483648_i32 : i32 to vector<16x512xi32>
    %24 = arith.cmpi uge, %22, %23 : vector<16x512xi32>
    %c0 = arith.constant 0 : index
    %c0_2 = arith.constant 0 : index
    %25 = vector.load %arg1[%c0, %c0_2] : memref<16x512xf32, #tpu.memory_space<vmem>>, vector<16x512xf32>
    %cst = arith.constant 2.000000e+00 : f32
    %26 = vector.broadcast %cst : f32 to vector<16x512xf32>
    %27 = arith.mulf %25, %26 : vector<16x512xf32>
    %cst_3 = arith.constant 0.000000e+00 : f32
    %28 = vector.broadcast %cst_3 : f32 to vector<16x512xf32>
    %29 = arith.select %24, %27, %28 : vector<16x512xi1>, vector<16x512xf32>
    %c0_4 = arith.constant 0 : index
    %c0_5 = arith.constant 0 : index
    %30 = vector.load %arg2[%c0_4, %c0_5] : memref<16x512xf32, #tpu.memory_space<vmem>>, vector<16x512xf32>
    tpu.vector_store %arg2[%c0_4, %c0_5], %29 {strides = array<i32>} : memref<16x512xf32, #tpu.memory_space<vmem>>, vector<16x512xf32>,
    return
  }
  func.func @transform_0(%arg0: i32) -> (i32, i32) {
    %c0_i32 = arith.constant 0 : i32
    %c0_i32_0 = arith.constant 0 : i32
    return %arg0, %c0_i32 : i32, i32
  }
  func.func @transform_1(%arg0: i32) -> (i32, i32) {
    %c0_i32 = arith.constant 0 : i32
    %c0_i32_0 = arith.constant 0 : i32
    return %arg0, %c0_i32 : i32, i32
  }
}

</mosaic_0001>

<bundles_post_ra>
// kernel: tpu_custom_call.1
= control target key start
LH: loop header
LB: loop body
LE: loop exit
PB: predicated region body
PF: predicated region fallthrough
CT: control target
= control target key end

     0   :  { %6 = vsyncpa [#allocation3], 0  ;;  %s282_s0 = inlined_call_operand.hbm [shape: f32[16,512], index: 0, kind: input, shape index: {}]   ;;  %s283_s1 = inlined_call_operand.hbm [shape: f32[16,512], index: 1, kind: output, shape index: {}]  }
   0x1   :  { %7 = vsyncpa [#allocation4], 0  ;;  %s226_s6 = smov [#allocation2]   ;;  %s178_s10 = scalar_lea.hbm %s282_s0, 1024 }
   0x2   :  { %s13_s7 = sshll.u32 %s226_s6, 4  ;;  %p179_p0 = scmp.ne.s32.totalorder %s282_s0, %s178_s10  ;;  %s14_s7 = int_to_ptr.vmem [resolvable:$true] %s13_s7 }
   0x3   :  { %p182_p1 = scmp.lt.u32.totalorder %s178_s10, %s282_s0 }
   0x5   :  { %p184_p2 = pnand %p182_p1, %p179_p0 }
   0x7   :  { %187 = shalt.err (!%p184_p2)
}
   0x8   :  { %s188_s15 = scalar_lea.vmem %s14_s7, 1024  ;;  %p193_p4 = scmp.lt.s32.totalorder %s14_s7, %s14_s7 }
   0x9   :  { %p189_p3 = scmp.ne.s32.totalorder %s14_s7, %s188_s15  ;;  %p194_p5 = scmp.lt.s32.totalorder %s188_s15, %s188_s15 }
   0xb   :  { %p195_p6 = por %p194_p5, %p193_p4 }
   0xd   :  { %p196_p7 = pnand %p195_p6, %p189_p3 }
   0xf   :  { %199 = shalt.err (!%p196_p7)
}
  0x10   :  { %s227_s16 = smov 512   ;;  %s228_s17 = smov 32  }
  0x11   :  { %19 = dma.hbm_to_vmem [thread:$0]  %s282_s0, 1024, %s14_s7, [#allocation3], %s227_s16, %s227_s16, %s228_s17  }
  0x12   :  { %222 = dma.done.wait [#allocation3], 1024  }
  0x13   :  { %223 = vsyncadd [#allocation3], 4294966272  ;;  %v23_v0 = vlaneseq  ;;  %v125_v12 = vld [vmem:[#allocation2] sm:$0xff]  ;;  %v126_v13 = vld [vmem:[#allocation2 + $0x8] sm:$0xff]  ;;  %s229_s0 = smov [#allocation5]  }
  0x14   :  { %v127_v17 = vld [vmem:[#allocation2 + $0x10] sm:$0xff]  ;;  %v255_v18 = vmul.f32 2.0, %v125_v12  ;;  %v257_v23 = vmul.f32 2.0, %v126_v13  ;;  %v128_v24 = vld [vmem:[#allocation2 + $0x18] sm:$0xff]  ;;  %v129_v52 = vld [vmem:[#allocation2 + $0x20] sm:$0xff]  ;;  %s162_s20 = sshll.u32 %s229_s0, 4  ;;  %s163_s20 = int_to_ptr.vmem [resolvable:$true] %s162_s20 }
  0x15   :  { %v24_v1 = vshrl.u32 %v23_v0, 7  ;;  %v27_v2 = vand.u32 127, %v23_v0  ;;  %v259_v27 = vmul.f32 2.0, %v127_v17  ;;  %v261_v36 = vmul.f32 2.0, %v128_v24  ;;  %s200_s21 = scalar_lea.vmem %s163_s20, 1024  ;;  %p205_p9 = scmp.lt.s32.totalorder %s163_s20, %s163_s20 }
  0x16   :  { %p201_p8 = scmp.ne.s32.totalorder %s163_s20, %s200_s21  ;;  %p206_p10 = scmp.lt.s32.totalorder %s200_s21, %s200_s21 }
  0x17   :  { %v35_v3 = vmul.u32 512, %v24_v1  ;;  %v28_v4 = vadd.s32 128, %v27_v2  ;;  %v29_v5 = vadd.s32 256, %v27_v2  ;;  %v30_v6 = vadd.s32 384, %v27_v2 }
  0x18   :  { %v25_v7 = vadd.s32 8, %v24_v1  ;;  %p207_p11 = por %p206_p10, %p205_p9 }
  0x19   :  { %v37_v8 = vadd.s32 %v35_v3, %v27_v2  ;;  %v38_v9 = vadd.s32 %v35_v3, %v28_v4  ;;  %v39_v10 = vadd.s32 %v35_v3, %v29_v5  ;;  %v40_v11 = vadd.s32 %v35_v3, %v30_v6 }
  0x1a   :  { %v36_v14 = vmul.u32 512, %v25_v7  ;;  %p208_p12 = pnand %p207_p11, %p201_p8 }
  0x1b   :  { %v45_v15 = vxor.u32 1234, %v37_v8  ;;  %v46_v16 = vxor.u32 1234, %v38_v9  ;;  %v47_v19 = vxor.u32 1234, %v39_v10  ;;  %v48_v20 = vxor.u32 1234, %v40_v11 }
  0x1c   :  { %v41_v25 = vadd.s32 %v36_v14, %v27_v2  ;;  %v42_v29 = vadd.s32 %v36_v14, %v28_v4  ;;  %v43_v33 = vadd.s32 %v36_v14, %v29_v5  ;;  %v44_v45 = vadd.s32 %v36_v14, %v30_v6 }
  0x1d   :  { %v53_v21 = vshrl.u32 %v45_v15, 16  ;;  %v54_v22 = vshrl.u32 %v46_v16, 16  ;;  %v55_v26 = vshrl.u32 %v47_v19, 16  ;;  %v56_v28 = vshrl.u32 %v48_v20, 16 }
  0x1e   :  { %v49_v32 = vxor.u32 1234, %v41_v25  ;;  %v50_v37 = vxor.u32 1234, %v42_v29  ;;  %v51_v41 = vxor.u32 1234, %v43_v33  ;;  %v52_v54 = vxor.u32 1234, %v44_v45 }
  0x1f   :  { %v61_v30 = vxor.u32 %v53_v21, %v45_v15  ;;  %v62_v31 = vxor.u32 %v54_v22, %v46_v16  ;;  %v63_v34 = vxor.u32 %v55_v26, %v47_v19  ;;  %v64_v35 = vxor.u32 %v56_v28, %v48_v20  ;;  %v130_v26 = vld [vmem:[#allocation2 + $0x28] sm:$0xff] }
  0x20   :  { %v57_v40 = vshrl.u32 %v49_v32, 16  ;;  %v58_v44 = vshrl.u32 %v50_v37, 16  ;;  %v59_v49 = vshrl.u32 %v51_v41, 16  ;;  %v60_v62 = vshrl.u32 %v52_v54, 16 }
  0x21   :  { %v69_v38 = vmul.u32 2146121005, %v61_v30  ;;  %v70_v39 = vmul.u32 2146121005, %v62_v31  ;;  %v137_v2 = vmul.f32 2.0, %v129_v52 }
  0x22   :  { %v71_v42 = vmul.u32 2146121005, %v63_v34  ;;  %v72_v43 = vmul.u32 2146121005, %v64_v35  ;;  %v65_v48 = vxor.u32 %v57_v40, %v49_v32  ;;  %v66_v53 = vxor.u32 %v58_v44, %v50_v37 }
  0x23   :  { %v77_v46 = vshrl.u32 %v69_v38, 15  ;;  %v78_v47 = vshrl.u32 %v70_v39, 15  ;;  %v67_v58 = vxor.u32 %v59_v49, %v51_v41  ;;  %v68_v6 = vxor.u32 %v60_v62, %v52_v54 }
  0x24   :  { %v79_v50 = vshrl.u32 %v71_v42, 15  ;;  %v80_v51 = vshrl.u32 %v72_v43, 15  ;;  %v73_v57 = vmul.u32 2146121005, %v65_v48  ;;  %v74_v61 = vmul.u32 2146121005, %v66_v53 }
  0x25   :  { %v85_v55 = vxor.u32 %v77_v46, %v69_v38  ;;  %v86_v56 = vxor.u32 %v78_v47, %v70_v39  ;;  %v75_v10 = vmul.u32 2146121005, %v67_v58  ;;  %v76_v14 = vmul.u32 2146121005, %v68_v6  ;;  %v131_v38 = vld [vmem:[#allocation2 + $0x30] sm:$0xff] }
  0x26   :  { %v87_v59 = vxor.u32 %v79_v50, %v71_v42  ;;  %v88_v60 = vxor.u32 %v80_v51, %v72_v43  ;;  %v81_v1 = vshrl.u32 %v73_v57, 15  ;;  %v82_v5 = vshrl.u32 %v74_v61, 15  ;;  %v132_v42 = vld [vmem:[#allocation2 + $0x38] sm:$0xff] }
  0x27   :  { %v93_v63 = vmul.u32 2221713035, %v85_v55  ;;  %v94_v0 = vmul.u32 2221713035, %v86_v56  ;;  %v83_v19 = vshrl.u32 %v75_v10, 15  ;;  %v84_v24 = vshrl.u32 %v76_v14, 15 }
  0x28   :  { %v95_v3 = vmul.u32 2221713035, %v87_v59  ;;  %v96_v4 = vmul.u32 2221713035, %v88_v60  ;;  %v89_v9 = vxor.u32 %v81_v1, %v73_v57  ;;  %v90_v13 = vxor.u32 %v82_v5, %v74_v61 }
  0x29   :  { %v101_v7 = vshrl.u32 %v93_v63, 16  ;;  %v102_v8 = vshrl.u32 %v94_v0, 16  ;;  %v91_v28 = vxor.u32 %v83_v19, %v75_v10  ;;  %v138_v35 = vmul.f32 2.0, %v130_v26 }
  0x2a   :  { %v103_v11 = vshrl.u32 %v95_v3, 16  ;;  %v104_v12 = vshrl.u32 %v96_v4, 16  ;;  %v97_v17 = vmul.u32 2221713035, %v89_v9  ;;  %v98_v22 = vmul.u32 2221713035, %v90_v13 }
  0x2b   :  { %v109_v15 = vxor.u32 %v101_v7, %v93_v63  ;;  %v110_v16 = vxor.u32 %v102_v8, %v94_v0  ;;  %v99_v37 = vmul.u32 2221713035, %v91_v28  ;;  %v92_v39 = vxor.u32 %v84_v24, %v76_v14 }
  0x2c   :  { %v111_v20 = vxor.u32 %v103_v11, %v95_v3  ;;  %v112_v21 = vxor.u32 %v104_v12, %v96_v4  ;;  %v105_v25 = vshrl.u32 %v97_v17, 16  ;;  %v106_v34 = vshrl.u32 %v98_v22, 16 }
  0x2d   :  { %vm117_vm0 = vcmp.ge.u32.totalorder %v109_v15, 2147483648  ;;  %vm118_vm1 = vcmp.ge.u32.totalorder %v110_v16, 2147483648  ;;  %v100_v41 = vmul.u32 2221713035, %v92_v39  ;;  %v139_v43 = vmul.f32 2.0, %v131_v38 }
  0x2e   :  { %v141_v29 = vsel %vm117_vm0, %v255_v18, 0.0  ;;  %v142_v30 = vsel %vm118_vm1, %v257_v23, 0.0  ;;  %vm119_vm2 = vcmp.ge.u32.totalorder %v111_v20, 2147483648  ;;  %vm120_vm3 = vcmp.ge.u32.totalorder %v112_v21, 2147483648 }
  0x2f   :  { %149 = vst [vmem:[#allocation5] sm:$0xff] %v141_v29  ;;  %150 = vst [vmem:[#allocation5 + $0x8] sm:$0xff] %v142_v30  ;;  %v143_v31 = vsel %vm119_vm2, %v259_v27, 0.0  ;;  %v144_v32 = vsel %vm120_vm3, %v261_v36, 0.0  ;;  %v113_v33 = vxor.u32 %v105_v25, %v97_v17  ;;  %v114_v18 = vxor.u32 %v106_v34, %v98_v22 }
  0x30   :  { %151 = vst [vmem:[#allocation5 + $0x10] sm:$0xff] %v143_v31  ;;  %152 = vst [vmem:[#allocation5 + $0x18] sm:$0xff] %v144_v32  ;;  %v107_v23 = vshrl.u32 %v99_v37, 16  ;;  %v108_v36 = vshrl.u32 %v100_v41, 16  ;;  %v140_v45 = vmul.f32 2.0, %v132_v42 }
  0x31   :  { %vm121_vm4 = vcmp.ge.u32.totalorder %v113_v33, 2147483648  ;;  %vm122_vm5 = vcmp.ge.u32.totalorder %v114_v18, 2147483648 }
  0x32   :  { %v145_v40 = vsel %vm121_vm4, %v137_v2, 0.0  ;;  %v146_v27 = vsel %vm122_vm5, %v138_v35, 0.0  ;;  %v115_v44 = vxor.u32 %v107_v23, %v99_v37  ;;  %v116_v46 = vxor.u32 %v108_v36, %v100_v41 }
  0x33   :  { %153 = vst [vmem:[#allocation5 + $0x20] sm:$0xff] %v145_v40  ;;  %154 = vst [vmem:[#allocation5 + $0x28] sm:$0xff] %v146_v27 }
  0x34   :  { %vm123_vm6 = vcmp.ge.u32.totalorder %v115_v44, 2147483648  ;;  %vm124_vm7 = vcmp.ge.u32.totalorder %v116_v46, 2147483648 }
  0x35   :  { %v147_v47 = vsel %vm123_vm6, %v139_v43, 0.0  ;;  %v148_v48 = vsel %vm124_vm7, %v140_v45, 0.0 }
  0x36   :  { %155 = vst [vmem:[#allocation5 + $0x30] sm:$0xff] %v147_v47  ;;  %156 = vst [vmem:[#allocation5 + $0x38] sm:$0xff] %v148_v48 }
  0x37   :  { %211 = shalt.err (!%p208_p12)
}
  0x38   :  { %s212_s24 = scalar_lea.hbm %s283_s1, 1024 }
  0x39   :  { %p213_p13 = scmp.ne.s32.totalorder %s283_s1, %s212_s24  ;;  %p216_p0 = scmp.lt.u32.totalorder %s212_s24, %s283_s1 }
  0x3b   :  { %p218_p1 = pnand %p216_p0, %p213_p13 }
  0x3d   :  { %221 = shalt.err (!%p218_p1)
}
  0x3e   :  { %168 = dma.vmem_to_hbm [thread:$0]  %s163_s20, 1024, %s283_s1, [#allocation4], %s227_s16, %s227_s16, %s228_s17  }
  0x3f   :  { %224 = dma.done.wait [#allocation4], 1024  }
  0x40   :  { %225 = vsyncadd [#allocation4], 4294966272 }
  0x41   :  { %172 = vsyncpa [#allocation3], 1 }
  0x42   :  { %173 = vsyncpa [#allocation4], 1 }

</bundles_post_ra>
